<compile_context>
chip_gen: v6e
topology: v6e:2x2x1
jax: 0.10.0
libtpu: 0.0.40
codegen_flags: <defaults>
</compile_context>

<pallas_src>
import jax
import jax.numpy as jnp
from jax.experimental import pallas as pl
from jax.experimental.pallas import tpu as pltpu


def _round_up(n, m):
    return (n + m - 1) // m * m


def _make_kernel(act):
    def kernel(x_ref, w1_ref, b1_ref, w2_ref, b2_ref, o_ref):
        x = x_ref[...]                                                   # (TB, inp_p)
        h = jnp.dot(x, w1_ref[...], preferred_element_type=jnp.float32)
        h = h + b1_ref[...]                                              # (1, hid_p) broadcast
        if act == "relu":
            h = jnp.maximum(h, 0.0)
        elif act == "tanh":
            h = jnp.tanh(h)
        elif act == "leaky_relu":
            h = jnp.where(h >= 0.0, h, 0.01 * h)
        elif act == "linear":
            pass
        else:
            raise ValueError(f"Unknown activation {act}")
        y = jnp.dot(h, w2_ref[...], preferred_element_type=jnp.float32)
        y = y + b2_ref[...]                                              # (1, out_p) broadcast
        o_ref[...] = y.astype(o_ref.dtype)

    return kernel


def _choose_batch_tile(B, inp_p, hid_p, out_p, itemsize, budget=16 * 1024 * 1024):
    # Double-buffered x and y tiles + f32 hidden intermediate, weights resident once.
    per_row = itemsize * (2 * inp_p + 2 * out_p) + 4 * hid_p
    weights = itemsize * (inp_p * hid_p + hid_p * out_p + hid_p + out_p)
    avail = max(budget - weights, 8 * per_row)
    cap = max(8, (avail // per_row) // 8 * 8)
    return int(min(1024, cap, _round_up(B, 8)))


def ai_model_forward(x, w1, b1, w2, b2, act="relu"):
    """x: (B, inp); w1: (inp, hid); b1: (hid,); w2: (hid, out); b2: (out,).

    Weights are stored pre-transposed (in_features, out_features) so the kernel
    does plain row-major matmuls on the MXU.
    """
    B, inp = x.shape
    hid = w1.shape[1]
    out = w2.shape[1]
    dtype = x.dtype

    inp_p = _round_up(inp, 128)
    hid_p = _round_up(hid, 128)
    out_p = _round_up(out, 128)

    # Zero-padding is an exact no-op for the math (padded hidden units see zero
    # weights and zero bias, so they contribute nothing through w2).
    x_p = jnp.pad(x, ((0, 0), (0, inp_p - inp)))
    w1_p = jnp.pad(w1, ((0, inp_p - inp), (0, hid_p - hid)))
    b1_p = jnp.pad(b1, (0, hid_p - hid)).reshape(1, hid_p)
    w2_p = jnp.pad(w2, ((0, hid_p - hid), (0, out_p - out)))
    b2_p = jnp.pad(b2, (0, out_p - out)).reshape(1, out_p)

    tb = _choose_batch_tile(B, inp_p, hid_p, out_p, x.dtype.itemsize)
    Bp = _round_up(B, tb)
    if Bp != B:
        x_p = jnp.pad(x_p, ((0, Bp - B), (0, 0)))
    n_tiles = Bp // tb

    kernel = _make_kernel(act)

    if n_tiles == 1:
        # Whole problem is a single VMEM-resident tile: skip the grid machinery
        # entirely (no per-step pipeline overhead, no BlockSpec DMA bookkeeping).
        y_p = pl.pallas_call(
            kernel,
            out_shape=jax.ShapeDtypeStruct((Bp, out_p), dtype),
            in_specs=[pl.BlockSpec(memory_space=pltpu.MemorySpace.VMEM)] * 5,
            out_specs=pl.BlockSpec(memory_space=pltpu.MemorySpace.VMEM),
        )(x_p, w1_p, b1_p, w2_p, b2_p)
    else:
        # Stream the batch; weights/biases map to block (0, 0) every step so
        # they are DMA'd once and stay resident in VMEM.
        y_p = pl.pallas_call(
            kernel,
            out_shape=jax.ShapeDtypeStruct((Bp, out_p), dtype),
            grid=(n_tiles,),
            in_specs=[
                pl.BlockSpec((tb, inp_p), lambda i: (i, 0)),
                pl.BlockSpec((inp_p, hid_p), lambda i: (0, 0)),
                pl.BlockSpec((1, hid_p), lambda i: (0, 0)),
                pl.BlockSpec((hid_p, out_p), lambda i: (0, 0)),
                pl.BlockSpec((1, out_p), lambda i: (0, 0)),
            ],
            out_specs=pl.BlockSpec((tb, out_p), lambda i: (i, 0)),
            compiler_params=pltpu.CompilerParams(
                dimension_semantics=("parallel",),
            ),
        )(x_p, w1_p, b1_p, w2_p, b2_p)

    return y_p[:B, :out]


def init_params(key, inp, hid, out):
    """Deterministic init mimicking nn.Linear defaults (uniform +/- 1/sqrt(fan_in))."""
    k1, k2, k3, k4 = jax.random.split(key, 4)
    lim1 = 1.0 / jnp.sqrt(jnp.float32(inp))
    lim2 = 1.0 / jnp.sqrt(jnp.float32(hid))
    # Stored already transposed: (in_features, out_features)
    w1 = jax.random.uniform(k1, (inp, hid), jnp.float32, -lim1, lim1)
    b1 = jax.random.uniform(k2, (hid,), jnp.float32, -lim1, lim1)
    w2 = jax.random.uniform(k3, (hid, out), jnp.float32, -lim2, lim2)
    b2 = jax.random.uniform(k4, (out,), jnp.float32, -lim2, lim2)
    return w1, b1, w2, b2


if __name__ == "__main__":
    B, INP, HID, OUT = 8, 16, 32, 8

    key = jax.random.PRNGKey(0)
    kx, kp = jax.random.split(key)
    x = jax.random.normal(kx, (B, INP), jnp.float32)
    w1, b1, w2, b2 = init_params(kp, INP, HID, OUT)

    # Small-shape path (single VMEM tile, grid-free call).
    y = jax.block_until_ready(ai_model_forward(x, w1, b1, w2, b2, act="relu"))
    h_ref = jnp.maximum(x @ w1 + b1, 0.0)
    y_ref = h_ref @ w2 + b2
    assert y.shape == (B, OUT)
    assert jnp.allclose(y, y_ref, atol=1e-5, rtol=1e-5)

    # Large-batch path (batch-tiled grid, weights resident in VMEM).
    B2 = 4096
    x2 = jax.random.normal(jax.random.PRNGKey(1), (B2, INP), jnp.float32)
    y2 = jax.block_until_ready(ai_model_forward(x2, w1, b1, w2, b2, act="relu"))
    y2_ref = jnp.maximum(x2 @ w1 + b1, 0.0) @ w2 + b2
    assert y2.shape == (B2, OUT)
    assert jnp.allclose(y2, y2_ref, atol=1e-4, rtol=1e-4)

    print("KERNEL_OK")
</pallas_src>

<mosaic_0001>
module attributes {stable_mosaic.version = 11 : i64} {
  func.func @kernel(%arg0: memref<8x128xf32, #tpu.memory_space<vmem>>, %arg1: memref<128x128xf32, #tpu.memory_space<vmem>>, %arg2: memref<1x128xf32, #tpu.memory_space<vmem>>, %arg3: memref<128x128xf32, #tpu.memory_space<vmem>>, %arg4: memref<1x128xf32, #tpu.memory_space<vmem>>, %arg5: memref<8x128xf32, #tpu.memory_space<vmem>>) attributes {dimension_semantics = [], scalar_prefetch = 0 : i64, scratch_operands = 0 : i64, tpu.core_type = #tpu.core_type<tc>} {
    %c0 = arith.constant 0 : index
    %c0_0 = arith.constant 0 : index
    %0 = vector.load %arg0[%c0, %c0_0] : memref<8x128xf32, #tpu.memory_space<vmem>>, vector<8x128xf32>
    %c0_1 = arith.constant 0 : index
    %c0_2 = arith.constant 0 : index
    %1 = vector.load %arg1[%c0_1, %c0_2] : memref<128x128xf32, #tpu.memory_space<vmem>>, vector<128x128xf32>
    %cst = arith.constant dense<0.000000e+00> : vector<8x128xf32>
    %2 = tpu.matmul %0, %1, %cst {dimension_numbers = #tpu.dot_dimension_numbers<[1], [0], [0], [1], [0, 0, 1, 1], [], []>} : vector<8x128xf32>, vector<128x128xf32>, vector<8x128xf32> -> vector<8x128xf32>
    %c0_3 = arith.constant 0 : index
    %c0_4 = arith.constant 0 : index
    %3 = vector.load %arg2[%c0_3, %c0_4] : memref<1x128xf32, #tpu.memory_space<vmem>>, vector<1x128xf32>
    %4 = vector.broadcast %3 : vector<1x128xf32> to vector<8x128xf32>
    %5 = arith.addf %2, %4 : vector<8x128xf32>
    %cst_5 = arith.constant 0.000000e+00 : f32
    %6 = vector.broadcast %cst_5 : f32 to vector<8x128xf32>
    %7 = arith.maximumf %5, %6 : vector<8x128xf32>
    %c0_6 = arith.constant 0 : index
    %c0_7 = arith.constant 0 : index
    %8 = vector.load %arg3[%c0_6, %c0_7] : memref<128x128xf32, #tpu.memory_space<vmem>>, vector<128x128xf32>
    %cst_8 = arith.constant dense<0.000000e+00> : vector<8x128xf32>
    %9 = tpu.matmul %7, %8, %cst_8 {dimension_numbers = #tpu.dot_dimension_numbers<[1], [0], [0], [1], [0, 0, 1, 1], [], []>} : vector<8x128xf32>, vector<128x128xf32>, vector<8x128xf32> -> vector<8x128xf32>
    %c0_9 = arith.constant 0 : index
    %c0_10 = arith.constant 0 : index
    %10 = vector.load %arg4[%c0_9, %c0_10] : memref<1x128xf32, #tpu.memory_space<vmem>>, vector<1x128xf32>
    %11 = vector.broadcast %10 : vector<1x128xf32> to vector<8x128xf32>
    %12 = arith.addf %9, %11 : vector<8x128xf32>
    %c0_11 = arith.constant 0 : index
    %c0_12 = arith.constant 0 : index
    %13 = vector.load %arg5[%c0_11, %c0_12] : memref<8x128xf32, #tpu.memory_space<vmem>>, vector<8x128xf32>
    tpu.vector_store %arg5[%c0_11, %c0_12], %12 {strides = array<i32>} : memref<8x128xf32, #tpu.memory_space<vmem>>, vector<8x128xf32>,
    return
  }
}

</mosaic_0001>

<bundles_post_ra>
// kernel: tpu_custom_call.1
= control target key start
LH: loop header
LB: loop body
LE: loop exit
PB: predicated region body
PF: predicated region fallthrough
CT: control target
= control target key end

     0   :  { %10 = vsyncpa [#allocation3], 0  ;;  %s555_s0 = inlined_call_operand.hbm [shape: f32[8,128], index: 0, kind: input, shape index: {}]   ;;  %s556_s1 = inlined_call_operand.hbm [shape: f32[128,128], index: 1, kind: input, shape index: {}]   ;;  %s557_s2 = inlined_call_operand.vmem [shape: f32[1,128], index: 2, kind: input, shape index: {}]   ;;  %s558_s3 = inlined_call_operand.hbm [shape: f32[128,128], index: 3, kind: input, shape index: {}]   ;;  %s559_s4 = inlined_call_operand.vmem [shape: f32[1,128], index: 4, kind: input, shape index: {}]   ;;  %s560_s5 = inlined_call_operand.hbm [shape: f32[8,128], index: 5, kind: output, shape index: {}]  }
   0x1   :  { %11 = vsyncpa [#allocation6], 0 }
   0x2   :  { %12 = vsyncpa [#allocation4], 0  ;;  %s465_s18 = smov [#allocation5]  }
   0x3   :  { %s28_s19 = sshll.u32 %s465_s18, 4  ;;  %s29_s19 = int_to_ptr.vmem [resolvable:$true] %s28_s19 }
   0x4   :  { %s387_s20 = scalar_lea.vmem %s29_s19, 2048  ;;  %p392_p1 = scmp.lt.s32.totalorder %s29_s19, %s29_s19 }
   0x5   :  { %p388_p0 = scmp.ne.s32.totalorder %s29_s19, %s387_s20  ;;  %p393_p2 = scmp.lt.s32.totalorder %s387_s20, %s387_s20 }
   0x7   :  { %p394_p3 = por %p393_p2, %p392_p1 }
   0x9   :  { %p395_p4 = pnand %p394_p3, %p388_p0 }
   0xb   :  { %398 = shalt.err (!%p395_p4)
}
   0xc   :  { %s466_s21 = smov 128   ;;  %s467_s22 = smov 8  }
   0xd   :  { %34 = dma.hbm_to_vmem [thread:$0]  %s556_s1, 2048, %s29_s19, [#allocation6], %s466_s21, %s466_s21, %s467_s22  }
   0xe   :  { %s468_s25 = smov [#allocation2]   ;;  %s469_s27 = smov [#allocation7]  }
   0xf   :  { %s19_s26 = sshll.u32 %s468_s25, 4  ;;  %s42_s28 = sshll.u32 %s469_s27, 4  ;;  %s20_s26 = int_to_ptr.vmem [resolvable:$true] %s19_s26  ;;  %s43_s28 = int_to_ptr.vmem [resolvable:$true] %s42_s28 }
  0x10   :  { %s407_s29 = scalar_lea.vmem %s20_s26, 128  ;;  %p412_p6 = scmp.lt.s32.totalorder %s20_s26, %s20_s26 }
  0x11   :  { %p408_p5 = scmp.ne.s32.totalorder %s20_s26, %s407_s29  ;;  %p413_p7 = scmp.lt.s32.totalorder %s407_s29, %s407_s29 }
  0x13   :  { %p414_p8 = por %p413_p7, %p412_p6 }
  0x15   :  { %p415_p9 = pnand %p414_p8, %p408_p5 }
  0x17   :  { %418 = shalt.err (!%p415_p9)
}
  0x18   :  { %22 = dma.hbm_to_vmem [thread:$0]  %s555_s0, 128, %s20_s26, [#allocation3]  }
  0x19   :  { %s427_s7 = scalar_lea.vmem %s43_s28, 2048  ;;  %p432_p11 = scmp.lt.s32.totalorder %s43_s28, %s43_s28 }
  0x1a   :  { %p428_p10 = scmp.ne.s32.totalorder %s43_s28, %s427_s7  ;;  %p433_p12 = scmp.lt.s32.totalorder %s427_s7, %s427_s7 }
  0x1c   :  { %p434_p13 = por %p433_p12, %p432_p11 }
  0x1e   :  { %p435_p0 = pnand %p434_p13, %p428_p10 }
  0x20   :  { %438 = shalt.err (!%p435_p0)
}
  0x21   :  { %48 = dma.hbm_to_vmem [thread:$0]  %s558_s3, 2048, %s43_s28, [#allocation6], %s466_s21, %s466_s21, %s467_s22  }
  0x22   :  { %459 = dma.done.wait [#allocation3], 128  }
  0x23   :  { %460 = vsyncadd [#allocation3], 4294967168 }
  0x24   :  { %461 = dma.done.wait [#allocation6], 4096  }
  0x25   :  { %462 = vsyncadd [#allocation6], 4294963200  ;;  %v470_v0 = vmov 0.0   ;;  %vm471_vm0 = vmmov 0   ;;  %v76_v1 = vld [vmem:[#allocation5 + $0x78] sm:$0xff]  ;;  %v75_v2 = vld [vmem:[#allocation5 + $0x70] sm:$0xff] }
  0x26   :  { %301 = vmatprep.subr.mxu0 %v470_v0  ;;  %333 = vmatprep.mubr.msk.f32.mxu0 %vm471_vm0, %v470_v0  ;;  %v74_v3 = vld [vmem:[#allocation5 + $0x68] sm:$0xff]  ;;  %v73_v4 = vld [vmem:[#allocation5 + $0x60] sm:$0xff]  ;;  %v170_v5 = vld [vmem:[#allocation7 + $0x78] sm:$0xff]  ;;  %s472_s11 = smov [#allocation8]  }
  0x27   :  { %336 = vmatprep.subr.mxu1 %v470_v0  ;;  %368 = vmatprep.mubr.msk.f32.mxu1 %vm471_vm0, %v470_v0  ;;  %v72_v6 = vld [vmem:[#allocation5 + $0x58] sm:$0xff]  ;;  %v169_v7 = vld [vmem:[#allocation7 + $0x70] sm:$0xff]  ;;  %v168_v8 = vld [vmem:[#allocation7 + $0x68] sm:$0xff]  ;;  %s255_s12 = sshll.u32 %s472_s11, 4  ;;  %s256_s12 = int_to_ptr.vmem [resolvable:$true] %s255_s12 }
  0x28   :  { %302 = vmatpush3.msra.mxu0 %v76_v1  ;;  %337 = vmatpush3.msra.mxu1 %v170_v5  ;;  %v71_v9 = vld [vmem:[#allocation5 + $0x50] sm:$0xff]  ;;  %v167_v10 = vld [vmem:[#allocation7 + $0x60] sm:$0xff]  ;;  %v70_v11 = vld [vmem:[#allocation5 + $0x48] sm:$0xff]  ;;  %s439_s13 = scalar_lea.vmem %s256_s12, 128  ;;  %p444_p2 = scmp.lt.s32.totalorder %s256_s12, %s256_s12 }
  0x29   :  { %303 = vmatprep.subr.mxu0 %v470_v0  ;;  %338 = vmatprep.subr.mxu1 %v470_v0  ;;  %v166_v12 = vld [vmem:[#allocation7 + $0x58] sm:$0xff]  ;;  %v69_v13 = vld [vmem:[#allocation5 + $0x40] sm:$0xff]  ;;  %v165_v14 = vld [vmem:[#allocation7 + $0x50] sm:$0xff]  ;;  %p440_p1 = scmp.ne.s32.totalorder %s256_s12, %s439_s13  ;;  %p445_p3 = scmp.lt.s32.totalorder %s439_s13, %s439_s13 }
  0x2a   :  { %304 = vmatpush3.msra.mxu0 %v75_v2  ;;  %339 = vmatpush3.msra.mxu1 %v169_v7  ;;  %v68_v15 = vld [vmem:[#allocation5 + $0x38] sm:$0xff]  ;;  %v164_v16 = vld [vmem:[#allocation7 + $0x48] sm:$0xff]  ;;  %v67_v17 = vld [vmem:[#allocation5 + $0x30] sm:$0xff] }
  0x2b   :  { %305 = vmatprep.subr.mxu0 %v470_v0  ;;  %340 = vmatprep.subr.mxu1 %v470_v0  ;;  %v163_v18 = vld [vmem:[#allocation7 + $0x40] sm:$0xff]  ;;  %v66_v19 = vld [vmem:[#allocation5 + $0x28] sm:$0xff]  ;;  %v162_v20 = vld [vmem:[#allocation7 + $0x38] sm:$0xff]  ;;  %p446_p4 = por %p445_p3, %p444_p2 }
  0x2c   :  { %306 = vmatpush3.msra.mxu0 %v74_v3  ;;  %341 = vmatpush3.msra.mxu1 %v168_v8  ;;  %v65_v21 = vld [vmem:[#allocation5 + $0x20] sm:$0xff]  ;;  %v161_v22 = vld [vmem:[#allocation7 + $0x30] sm:$0xff]  ;;  %v64_v23 = vld [vmem:[#allocation5 + $0x18] sm:$0xff] }
  0x2d   :  { %307 = vmatprep.subr.mxu0 %v470_v0  ;;  %342 = vmatprep.subr.mxu1 %v470_v0  ;;  %v160_v24 = vld [vmem:[#allocation7 + $0x28] sm:$0xff]  ;;  %v63_v25 = vld [vmem:[#allocation5 + $0x10] sm:$0xff]  ;;  %v159_v26 = vld [vmem:[#allocation7 + $0x20] sm:$0xff]  ;;  %p447_p5 = pnand %p446_p4, %p440_p1 }
  0x2e   :  { %308 = vmatpush3.msra.mxu0 %v73_v4  ;;  %343 = vmatpush3.msra.mxu1 %v167_v10  ;;  %v62_v27 = vld [vmem:[#allocation5 + $0x8] sm:$0xff]  ;;  %v158_v28 = vld [vmem:[#allocation7 + $0x18] sm:$0xff]  ;;  %v61_v29 = vld [vmem:[#allocation5] sm:$0xff] }
  0x2f   :  { %309 = vmatprep.subr.mxu0 %v470_v0  ;;  %344 = vmatprep.subr.mxu1 %v470_v0  ;;  %v60_v30 = vld [vmem:[#allocation2] sm:$0xff]  ;;  %v157_v31 = vld [vmem:[#allocation7 + $0x10] sm:$0xff]  ;;  %v156_v32 = vld [vmem:[#allocation7 + $0x8] sm:$0xff] }
  0x30   :  { %310 = vmatpush3.msra.mxu0 %v72_v6  ;;  %345 = vmatpush3.msra.mxu1 %v166_v12  ;;  %v155_v33 = vld [vmem:[#allocation7] sm:$0xff]  ;;  %v265_v34 = vld [vmem:[%s557_s2] ss:$0 sm:$0xff] }
  0x31   :  { %311 = vmatprep.subr.mxu0 %v470_v0  ;;  %346 = vmatprep.subr.mxu1 %v470_v0  ;;  %v266_v39 = vld [vmem:[%s559_s4] ss:$0 sm:$0xff] }
  0x32   :  { %312 = vmatpush3.msra.mxu0 %v71_v9  ;;  %347 = vmatpush3.msra.mxu1 %v165_v14 }
  0x33   :  { %313 = vmatprep.subr.mxu0 %v470_v0  ;;  %348 = vmatprep.subr.mxu1 %v470_v0 }
  0x34   :  { %314 = vmatpush3.msra.mxu0 %v70_v11  ;;  %349 = vmatpush3.msra.mxu1 %v164_v16 }
  0x35   :  { %315 = vmatprep.subr.mxu0 %v470_v0  ;;  %350 = vmatprep.subr.mxu1 %v470_v0 }
  0x36   :  { %316 = vmatpush3.msra.mxu0 %v69_v13  ;;  %351 = vmatpush3.msra.mxu1 %v163_v18 }
  0x37   :  { %317 = vmatprep.subr.mxu0 %v470_v0  ;;  %352 = vmatprep.subr.mxu1 %v470_v0 }
  0x38   :  { %318 = vmatpush3.msra.mxu0 %v68_v15  ;;  %353 = vmatpush3.msra.mxu1 %v162_v20 }
  0x39   :  { %319 = vmatprep.subr.mxu0 %v470_v0  ;;  %354 = vmatprep.subr.mxu1 %v470_v0 }
  0x3a   :  { %320 = vmatpush3.msra.mxu0 %v67_v17  ;;  %355 = vmatpush3.msra.mxu1 %v161_v22 }
  0x3b   :  { %321 = vmatprep.subr.mxu0 %v470_v0  ;;  %356 = vmatprep.subr.mxu1 %v470_v0 }
  0x3c   :  { %322 = vmatpush3.msra.mxu0 %v66_v19  ;;  %357 = vmatpush3.msra.mxu1 %v160_v24 }
  0x3d   :  { %323 = vmatprep.subr.mxu0 %v470_v0  ;;  %358 = vmatprep.subr.mxu1 %v470_v0 }
  0x3e   :  { %324 = vmatpush3.msra.mxu0 %v65_v21  ;;  %359 = vmatpush3.msra.mxu1 %v159_v26 }
  0x3f   :  { %325 = vmatprep.subr.mxu0 %v470_v0  ;;  %360 = vmatprep.subr.mxu1 %v470_v0 }
  0x40   :  { %326 = vmatpush3.msra.mxu0 %v64_v23  ;;  %361 = vmatpush3.msra.mxu1 %v158_v28 }
  0x41   :  { %327 = vmatprep.subr.mxu0 %v470_v0  ;;  %362 = vmatprep.subr.mxu1 %v470_v0 }
  0x42   :  { %328 = vmatpush3.msra.mxu0 %v63_v25  ;;  %363 = vmatpush3.msra.mxu1 %v157_v31 }
  0x43   :  { %329 = vmatprep.subr.mxu0 %v470_v0  ;;  %364 = vmatprep.subr.mxu1 %v470_v0 }
  0x44   :  { %330 = vmatpush3.msra.mxu0 %v62_v27  ;;  %365 = vmatpush3.msra.mxu1 %v156_v32 }
  0x45   :  { %331 = vmatprep.subr.mxu0 %v470_v0  ;;  %366 = vmatprep.subr.mxu1 %v470_v0 }
  0x46   :  { %332 = vmatpush3.msra.mxu0 %v61_v29  ;;  %367 = vmatpush3.msra.mxu1 %v155_v33 }
  0x47   :  { %334 = vmatmul.mubr.f32.vlgmr.msra.gmra.mxu0 %v60_v30 }
 0x107   :  { %v150_v35 = vpop.f32.mrf.mxu0 }
 0x108   :  { %v151_v36 = vadd.f32 %v265_v34, %v150_v35 }
 0x109   :  { %v335_v37 = vpop.f32.mrf.mxu0 }
 0x10a   :  { %v154_v38 = vmax.f32 %v151_v36, 0.0 }
 0x10c   :  { %369 = vmatmul.mubr.f32.vlgmr.msra.gmra.mxu1 %v154_v38 }
 0x1cc   :  { %v244_v40 = vpop.f32.mrf.mxu1 }
 0x1cd   :  { %v245_v41 = vadd.f32 %v266_v39, %v244_v40 }
 0x1ce   :  { %v370_v42 = vpop.f32.mrf.mxu1 }
 0x1cf   :  { %248 = vst [vmem:[#allocation8] sm:$0xff] %v245_v41 }
 0x1d0   :  { %450 = shalt.err (!%p447_p5)
}
 0x1d1   :  { %258 = dma.vmem_to_hbm [thread:$0]  %s256_s12, 128, %s560_s5, [#allocation4]  }
 0x1d2   :  { %463 = dma.done.wait [#allocation4], 128  }
 0x1d3   :  { %464 = vsyncadd [#allocation4], 4294967168 }
 0x1d4   :  { %262 = vsyncpa [#allocation3], 1 }
 0x1d5   :  { %263 = vsyncpa [#allocation6], 1 }
 0x1d6   :  { %264 = vsyncpa [#allocation4], 1 }

</bundles_post_ra>
